<compile_context>
chip_gen: v7x
topology: tpu7x:2x2x1
jax: 0.10.0
libtpu: 0.0.40
codegen_flags: <defaults>
</compile_context>

<pallas_src>
import functools

import jax
import jax.numpy as jnp
from jax.experimental import pallas as pl
from jax.experimental.pallas import tpu as pltpu

_IGNORE_INDEX = -100   # nn.NLLLoss default
_OUT_LANES = 128       # lane-dense partial-result rows


def _nll_partial_kernel(n_rows, pred_ref, tgt_ref, sum_ref, cnt_ref,
                        acc_sum, acc_cnt):
    s = pl.program_id(0)           # parallel split (2 TCs on v7x, loop elsewhere)
    i = pl.program_id(1)           # streaming row-block axis (accumulator axis)
    n_inner = pl.num_programs(1)

    @pl.when(i == 0)
    def _():
        acc_sum[...] = jnp.zeros_like(acc_sum)
        acc_cnt[...] = jnp.zeros_like(acc_cnt)

    pred = pred_ref[...]           # (TN, C) native dtype (f32 or bf16)
    tgt = tgt_ref[...]             # (TN, 1) int32
    tn, c = pred.shape

    # Un-clamped linear block index -> absolute rows covered by this step.
    # Duplicate (clamped) padding blocks and the ragged tail give rows >= n_rows
    # and are masked out below.
    blk = s * n_inner + i
    rows = jax.lax.broadcasted_iota(jnp.int32, (tn, 1), 0) + blk * tn
    row_ok = rows < n_rows                                      # (TN, 1)

    # Fold the row mask into the target with a cheap (TN,1) select so the big
    # (TN, C) select needs only a single compare per element.  ignore_index
    # (-100) targets never equal a class index, so no extra mask is needed.
    eff_tgt = jnp.where(row_ok, tgt, jnp.int32(-1))             # (TN, 1)
    classes = jax.lax.broadcasted_iota(jnp.int32, (tn, c), 1)   # (TN, C)
    picked = jnp.where(classes == eff_tgt, pred, jnp.zeros((), pred.dtype))

    # Cross-vreg accumulation: collapse the row tile onto an (8, C) vreg-shaped
    # accumulator with plain VALU adds (no per-step XLU reduce, no loop-carried
    # SMEM scalar).  Cast to f32 only for accumulation.
    acc_sum[...] += jnp.sum(
        picked.astype(jnp.float32).reshape(tn // 8, 8, c), axis=0)
    valid = row_ok & (tgt != _IGNORE_INDEX)                     # (TN, 1)
    acc_cnt[...] += jnp.sum(
        valid.astype(jnp.float32).reshape(tn // 8, 8, 1), axis=0)

    # One intra-vreg reduce per split; lane-dense (1, 128) unmasked stores.
    @pl.when(i == n_inner - 1)
    def _():
        sum_ref[...] = jnp.full((1, _OUT_LANES), jnp.sum(acc_sum[...]),
                                dtype=jnp.float32)
        cnt_ref[...] = jnp.full((1, _OUT_LANES), jnp.sum(acc_cnt[...]),
                                dtype=jnp.float32)


def _round_up(x, m):
    return ((x + m - 1) // m) * m


def arch_loss(pred, target, latency, memory, *, target_lat, target_mem,
              vmem_tile_budget_bytes=20 * 1024 * 1024, max_splits=2):
    """Pallas implementation of ArchLoss.forward.

    pred:    (N, C) log-probabilities (f32 or bf16; processed in native dtype)
    target:  (N,)   int class indices (-100 = ignore)
    latency: (L,)   float latency samples
    memory:  (M,)   float memory samples
    Returns (loss, cls_loss, loss_lat, loss_mem, mean_lat, mean_mem) scalars.
    """
    n, c = pred.shape
    itemsize = jnp.dtype(pred.dtype).itemsize
    row_align = max(8, 32 // itemsize)        # f32:8, bf16:16, int8:32 sublanes

    # --- byte-budgeted row tile (VMEM cost of BOTH double-buffered tiles,
    #     lane padding included) ---------------------------------------------
    pred_row_bytes = _round_up(c, 128) * itemsize       # pred tile, lane-padded
    tgt_row_bytes = 128 * 4                             # (TN,1) int32 -> 128 lanes
    per_row_bytes = 2 * (pred_row_bytes + tgt_row_bytes)
    tn = max(row_align, vmem_tile_budget_bytes // per_row_bytes)
    tn = min(tn, _round_up(n, row_align))
    tn = max(row_align, (tn // row_align) * row_align)

    num_blocks = pl.cdiv(n, tn)
    splits = max(1, min(max_splits, num_blocks))        # 2 -> both TCs on v7x
    steps = pl.cdiv(num_blocks, splits)

    tgt2d = target.astype(jnp.int32).reshape(n, 1)

    def tile_map(s, i):
        # Clamp so padding steps (splits*steps > num_blocks) re-read the last
        # real block; their rows are masked out inside the kernel.
        return (jnp.minimum(s * steps + i, num_blocks - 1), 0)

    kernel = functools.partial(_nll_partial_kernel, n)

    cost = pl.CostEstimate(
        flops=3 * n * c,
        transcendentals=0,
        bytes_accessed=n * c * itemsize + n * 4 + 2 * splits * _OUT_LANES * 4)

    part_sum, part_cnt = pl.pallas_call(
        kernel,
        out_shape=(jax.ShapeDtypeStruct((splits, _OUT_LANES), jnp.float32),
                   jax.ShapeDtypeStruct((splits, _OUT_LANES), jnp.float32)),
        grid=(splits, steps),
        in_specs=[
            pl.BlockSpec((tn, c), tile_map),            # pred tile (native dtype)
            pl.BlockSpec((tn, 1), tile_map),            # target tile
        ],
        out_specs=(
            pl.BlockSpec((1, _OUT_LANES), lambda s, i: (s, 0)),
            pl.BlockSpec((1, _OUT_LANES), lambda s, i: (s, 0)),
        ),
        scratch_shapes=[
            pltpu.VMEM((8, c), jnp.float32),            # per-split log-prob sums
            pltpu.VMEM((8, 1), jnp.float32),            # per-split valid counts
        ],
        compiler_params=pltpu.CompilerParams(
            dimension_semantics=("parallel", "arbitrary"),
            vmem_limit_bytes=32 * 1024 * 1024),
        cost_estimate=cost,
    )(pred, tgt2d)

    # --- scalar epilogue in plain JAX (free; no SMEM plumbing in kernel) -----
    sum_logp = jnp.sum(part_sum[:, 0])
    n_valid = jnp.sum(part_cnt[:, 0])
    cls_loss = -sum_logp / n_valid

    mean_lat = jnp.mean(latency).astype(jnp.float32)
    mean_mem = jnp.mean(memory).astype(jnp.float32)

    if target_lat:   # static Python constant (constructor arg)
        mul_lat = jnp.where(jnp.float32(target_lat) < mean_lat,
                            jnp.float32(4.0), jnp.float32(0.002))
        loss_lat = mul_lat * jnp.log(mean_lat / jnp.float32(target_lat))
    else:
        loss_lat = jnp.float32(0.0)

    if target_mem:
        mul_mem = jnp.where(jnp.float32(target_mem) < mean_mem,
                            jnp.float32(4.0), jnp.float32(0.002))
        loss_mem = mul_mem * jnp.log(mean_mem / jnp.float32(target_mem))
    else:
        loss_mem = jnp.float32(0.0)

    loss = cls_loss + loss_lat + loss_mem
    return (loss, cls_loss, loss_lat, loss_mem, mean_lat, mean_mem)


def _reference(pred, target, latency, memory, target_lat, target_mem):
    """Pure-JAX reference mirroring the PyTorch forward (incl. ignore_index)."""
    mean_lat = jnp.mean(latency)
    mean_mem = jnp.mean(memory)
    valid = target != _IGNORE_INDEX
    safe_t = jnp.where(valid, target, 0)
    picked = jnp.where(valid,
                       pred[jnp.arange(pred.shape[0]), safe_t].astype(jnp.float32),
                       0.0)
    cls_loss = -jnp.sum(picked) / jnp.sum(valid).astype(jnp.float32)
    loss_lat = jnp.float32(0.0)
    loss_mem = jnp.float32(0.0)
    if target_lat:
        mul_lat = jnp.where(target_lat < mean_lat, 4.0, 0.002)
        loss_lat = mul_lat * jnp.log(mean_lat / target_lat)
    if target_mem:
        mul_mem = jnp.where(target_mem < mean_mem, 4.0, 0.002)
        loss_mem = mul_mem * jnp.log(mean_mem / target_mem)
    loss = cls_loss + loss_lat + loss_mem
    return (loss, cls_loss, loss_lat, loss_mem, mean_lat, mean_mem)


def _check(got, want):
    for g, w in zip(got, want):
        assert jnp.allclose(jnp.asarray(g, jnp.float32),
                            jnp.asarray(w, jnp.float32),
                            rtol=1e-5, atol=1e-5), (g, w)


if __name__ == "__main__":
    key = jax.random.PRNGKey(0)
    TARGET_LAT = 0.5
    TARGET_MEM = 2.0
    L, M = 8, 8

    # ---- test 1: small shapes, single block, default byte budget ------------
    k_logits, k_tgt, k_lat, k_mem, key = jax.random.split(key, 5)
    N, C = 8, 4
    logits = jax.random.normal(k_logits, (N, C), dtype=jnp.float32)
    pred = jax.nn.log_softmax(logits, axis=-1)
    target = jax.random.randint(k_tgt, (N,), 0, C, dtype=jnp.int32)
    latency = jax.random.uniform(k_lat, (L,), jnp.float32, 0.1, 1.5)
    memory = jax.random.uniform(k_mem, (M,), jnp.float32, 0.5, 4.0)

    out = jax.block_until_ready(
        arch_loss(pred, target, latency, memory,
                  target_lat=TARGET_LAT, target_mem=TARGET_MEM))
    _check(out, _reference(pred, target, latency, memory, TARGET_LAT, TARGET_MEM))

    # ---- test 2: tiled + 2-way split path, ragged tail, duplicate padding
    #      block, one ignore_index target (small budget forces 128-row tiles) --
    k_logits, k_tgt, k_lat, k_mem, key = jax.random.split(key, 5)
    N2, C2 = 300, 16
    logits2 = jax.random.normal(k_logits, (N2, C2), dtype=jnp.float32)
    pred2 = jax.nn.log_softmax(logits2, axis=-1)
    target2 = jax.random.randint(k_tgt, (N2,), 0, C2, dtype=jnp.int32)
    target2 = target2.at[7].set(_IGNORE_INDEX)            # exercise ignore_index
    latency2 = jax.random.uniform(k_lat, (L,), jnp.float32, 0.1, 1.5)
    memory2 = jax.random.uniform(k_mem, (M,), jnp.float32, 0.5, 4.0)

    out2 = jax.block_until_ready(
        arch_loss(pred2, target2, latency2, memory2,
                  target_lat=TARGET_LAT, target_mem=TARGET_MEM,
                  vmem_tile_budget_bytes=256 * 1024))
    _check(out2, _reference(pred2, target2, latency2, memory2,
                            TARGET_LAT, TARGET_MEM))

    # ---- test 3: bf16 pred (native-dtype select path), even 2-way split -----
    k_logits, k_tgt, k_lat, k_mem, key = jax.random.split(key, 5)
    N3, C3 = 64, 8
    logits3 = jax.random.normal(k_logits, (N3, C3), dtype=jnp.float32)
    pred3 = jax.nn.log_softmax(logits3, axis=-1).astype(jnp.bfloat16)
    target3 = jax.random.randint(k_tgt, (N3,), 0, C3, dtype=jnp.int32)
    latency3 = jax.random.uniform(k_lat, (L,), jnp.float32, 0.1, 1.5)
    memory3 = jax.random.uniform(k_mem, (M,), jnp.float32, 0.5, 4.0)

    out3 = jax.block_until_ready(
        arch_loss(pred3, target3, latency3, memory3,
                  target_lat=TARGET_LAT, target_mem=TARGET_MEM,
                  vmem_tile_budget_bytes=48 * 1024))
    _check(out3, _reference(pred3, target3, latency3, memory3,
                            TARGET_LAT, TARGET_MEM))

    print("KERNEL_OK")
</pallas_src>

<mosaic_0001>
module attributes {stable_mosaic.version = 11 : i64} {
  func.func @_nll_partial_kernel(%arg0: i32, %arg1: i32, %arg2: memref<8x4xf32, #tpu.memory_space<vmem>>, %arg3: memref<8x1xi32, #tpu.memory_space<vmem>>, %arg4: memref<1x128xf32, #tpu.memory_space<vmem>>, %arg5: memref<1x128xf32, #tpu.memory_space<vmem>>, %arg6: memref<8x4xf32, #tpu.memory_space<vmem>>, %arg7: memref<8x1xf32, #tpu.memory_space<vmem>>) attributes {dimension_semantics = [#tpu.dimension_semantics<parallel>, #tpu.dimension_semantics<arbitrary>], iteration_bounds = array<i64: 1, 1>, scalar_prefetch = 0 : i64, scratch_operands = 2 : i64, tpu.core_type = #tpu.core_type<tc>, window_params = [{transform_indices = @transform_0, window_bounds = array<i64: 8, 4>}, {transform_indices = @transform_1, window_bounds = array<i64: 8, 1>}, {transform_indices = @transform_2, window_bounds = array<i64: 1, 128>}, {transform_indices = @transform_3, window_bounds = array<i64: 1, 128>}]} {
    %c0_i32 = arith.constant 0 : i32
    %0 = arith.cmpi eq, %arg1, %c0_i32 : i32
    %1 = arith.extui %0 : i1 to i32
    %c0_i32_0 = arith.constant 0 : i32
    %2 = arith.cmpi ne, %1, %c0_i32_0 : i32
    scf.if %2 {
      %cst_17 = arith.constant 0.000000e+00 : f32
      %38 = vector.broadcast %cst_17 : f32 to vector<8x4xf32>
      %c0_18 = arith.constant 0 : index
      %c0_19 = arith.constant 0 : index
      %39 = vector.load %arg6[%c0_18, %c0_19] : memref<8x4xf32, #tpu.memory_space<vmem>>, vector<8x4xf32>
      tpu.vector_store %arg6[%c0_18, %c0_19], %38 {strides = array<i32>} : memref<8x4xf32, #tpu.memory_space<vmem>>, vector<8x4xf32>,
      %cst_20 = arith.constant 0.000000e+00 : f32
      %40 = vector.broadcast %cst_20 : f32 to vector<8x1xf32>
      %c0_21 = arith.constant 0 : index
      %c0_22 = arith.constant 0 : index
      %41 = vector.load %arg7[%c0_21, %c0_22] : memref<8x1xf32, #tpu.memory_space<vmem>>, vector<8x1xf32>
      tpu.vector_store %arg7[%c0_21, %c0_22], %40 {strides = array<i32>} : memref<8x1xf32, #tpu.memory_space<vmem>>, vector<8x1xf32>,
    } else {
    }
    %c0 = arith.constant 0 : index
    %c0_1 = arith.constant 0 : index
    %3 = vector.load %arg2[%c0, %c0_1] : memref<8x4xf32, #tpu.memory_space<vmem>>, vector<8x4xf32>
    %c0_2 = arith.constant 0 : index
    %c0_3 = arith.constant 0 : index
    %4 = vector.load %arg3[%c0_2, %c0_3] : memref<8x1xi32, #tpu.memory_space<vmem>>, vector<8x1xi32>
    %c1_i32 = arith.constant 1 : i32
    %5 = arith.muli %arg0, %c1_i32 : i32
    %6 = arith.addi %5, %arg1 : i32
    %7 = tpu.iota {dimensions = array<i32: 0>} : vector<8x1xi32>
    %c8_i32 = arith.constant 8 : i32
    %8 = arith.muli %6, %c8_i32 : i32
    %9 = vector.broadcast %8 : i32 to vector<8x1xi32>
    %10 = arith.addi %7, %9 : vector<8x1xi32>
    %c8_i32_4 = arith.constant 8 : i32
    %11 = vector.broadcast %c8_i32_4 : i32 to vector<8x1xi32>
    %12 = arith.cmpi slt, %10, %11 : vector<8x1xi32>
    %c-1_i32 = arith.constant -1 : i32
    %13 = vector.broadcast %c-1_i32 : i32 to vector<8x1xi32>
    %14 = arith.select %12, %4, %13 : vector<8x1xi1>, vector<8x1xi32>
    %15 = tpu.iota {dimensions = array<i32: 1>} : vector<8x4xi32>
    %16 = vector.broadcast %14 : vector<8x1xi32> to vector<8x4xi32>
    %17 = arith.cmpi eq, %15, %16 : vector<8x4xi32>
    %cst = arith.constant 0.000000e+00 : f32
    %18 = vector.broadcast %cst : f32 to vector<8x4xf32>
    %19 = arith.select %17, %3, %18 : vector<8x4xi1>, vector<8x4xf32>
    %c0_5 = arith.constant 0 : index
    %c0_6 = arith.constant 0 : index
    %20 = vector.load %arg6[%c0_5, %c0_6] : memref<8x4xf32, #tpu.memory_space<vmem>>, vector<8x4xf32>
    %21 = vector.shape_cast %19 : vector<8x4xf32> to vector<1x8x4xf32>
    %cst_7 = arith.constant dense<0.000000e+00> : vector<8x4xf32>
    %22 = vector.multi_reduction <add>, %21, %cst_7 [0] : vector<1x8x4xf32> to vector<8x4xf32>
    %23 = arith.addf %20, %22 : vector<8x4xf32>
    %c0_8 = arith.constant 0 : index
    %c0_9 = arith.constant 0 : index
    %24 = vector.load %arg6[%c0_8, %c0_9] : memref<8x4xf32, #tpu.memory_space<vmem>>, vector<8x4xf32>
    tpu.vector_store %arg6[%c0_8, %c0_9], %23 {strides = array<i32>} : memref<8x4xf32, #tpu.memory_space<vmem>>, vector<8x4xf32>,
    %c-100_i32 = arith.constant -100 : i32
    %25 = vector.broadcast %c-100_i32 : i32 to vector<8x1xi32>
    %26 = arith.cmpi ne, %4, %25 : vector<8x1xi32>
    %27 = arith.andi %12, %26 : vector<8x1xi1>
    %c0_10 = arith.constant 0 : index
    %c0_11 = arith.constant 0 : index
    %28 = vector.load %arg7[%c0_10, %c0_11] : memref<8x1xf32, #tpu.memory_space<vmem>>, vector<8x1xf32>
    %29 = arith.extui %27 : vector<8x1xi1> to vector<8x1xi32>
    %30 = arith.sitofp %29 : vector<8x1xi32> to vector<8x1xf32>
    %31 = vector.shape_cast %30 : vector<8x1xf32> to vector<1x8x1xf32>
    %cst_12 = arith.constant dense<0.000000e+00> : vector<8x1xf32>
    %32 = vector.multi_reduction <add>, %31, %cst_12 [0] : vector<1x8x1xf32> to vector<8x1xf32>
    %33 = arith.addf %28, %32 : vector<8x1xf32>
    %c0_13 = arith.constant 0 : index
    %c0_14 = arith.constant 0 : index
    %34 = vector.load %arg7[%c0_13, %c0_14] : memref<8x1xf32, #tpu.memory_space<vmem>>, vector<8x1xf32>
    tpu.vector_store %arg7[%c0_13, %c0_14], %33 {strides = array<i32>} : memref<8x1xf32, #tpu.memory_space<vmem>>, vector<8x1xf32>,
    %c0_i32_15 = arith.constant 0 : i32
    %35 = arith.cmpi eq, %arg1, %c0_i32_15 : i32
    %36 = arith.extui %35 : i1 to i32
    %c0_i32_16 = arith.constant 0 : i32
    %37 = arith.cmpi ne, %36, %c0_i32_16 : i32
    scf.if %37 {
      %c0_17 = arith.constant 0 : index
      %c0_18 = arith.constant 0 : index
      %38 = vector.load %arg6[%c0_17, %c0_18] : memref<8x4xf32, #tpu.memory_space<vmem>>, vector<8x4xf32>
      %39 = vector.shape_cast %38 : vector<8x4xf32> to vector<1x8x4xf32>
      %cst_19 = arith.constant dense<0.000000e+00> : vector<1xf32>
      %40 = vector.multi_reduction <add>, %39, %cst_19 [1, 2] : vector<1x8x4xf32> to vector<1xf32>
      %41 = vector.shape_cast %40 : vector<1xf32> to vector<1x1x1xf32>
      %42 = vector.extract %41[0, 0, 0] : f32 from vector<1x1x1xf32>
      %43 = vector.broadcast %42 : f32 to vector<1x128xf32>
      %c0_20 = arith.constant 0 : index
      %c0_21 = arith.constant 0 : index
      %44 = vector.load %arg4[%c0_20, %c0_21] : memref<1x128xf32, #tpu.memory_space<vmem>>, vector<1x128xf32>
      tpu.vector_store %arg4[%c0_20, %c0_21], %43 {strides = array<i32>} : memref<1x128xf32, #tpu.memory_space<vmem>>, vector<1x128xf32>,
      %c0_22 = arith.constant 0 : index
      %c0_23 = arith.constant 0 : index
      %45 = vector.load %arg7[%c0_22, %c0_23] : memref<8x1xf32, #tpu.memory_space<vmem>>, vector<8x1xf32>
      %46 = vector.shape_cast %45 : vector<8x1xf32> to vector<1x8x1xf32>
      %cst_24 = arith.constant dense<0.000000e+00> : vector<1xf32>
      %47 = vector.multi_reduction <add>, %46, %cst_24 [1, 2] : vector<1x8x1xf32> to vector<1xf32>
      %48 = vector.shape_cast %47 : vector<1xf32> to vector<1x1x1xf32>
      %49 = vector.extract %48[0, 0, 0] : f32 from vector<1x1x1xf32>
      %50 = vector.broadcast %49 : f32 to vector<1x128xf32>
      %c0_25 = arith.constant 0 : index
      %c0_26 = arith.constant 0 : index
      %51 = vector.load %arg5[%c0_25, %c0_26] : memref<1x128xf32, #tpu.memory_space<vmem>>, vector<1x128xf32>
      tpu.vector_store %arg5[%c0_25, %c0_26], %50 {strides = array<i32>} : memref<1x128xf32, #tpu.memory_space<vmem>>, vector<1x128xf32>,
    } else {
    }
    return
  }
  func.func @transform_0(%arg0: i32, %arg1: i32) -> (i32, i32) {
    %c1_i32 = arith.constant 1 : i32
    %0 = arith.muli %arg0, %c1_i32 : i32
    %1 = arith.addi %0, %arg1 : i32
    %c0_i32 = arith.constant 0 : i32
    %2 = arith.minsi %1, %c0_i32 : i32
    %c0_i32_0 = arith.constant 0 : i32
    %c0_i32_1 = arith.constant 0 : i32
    return %2, %c0_i32_0 : i32, i32
  }
  func.func @transform_1(%arg0: i32, %arg1: i32) -> (i32, i32) {
    %c1_i32 = arith.constant 1 : i32
    %0 = arith.muli %arg0, %c1_i32 : i32
    %1 = arith.addi %0, %arg1 : i32
    %c0_i32 = arith.constant 0 : i32
    %2 = arith.minsi %1, %c0_i32 : i32
    %c0_i32_0 = arith.constant 0 : i32
    %c0_i32_1 = arith.constant 0 : i32
    return %2, %c0_i32_0 : i32, i32
  }
  func.func @transform_2(%arg0: i32, %arg1: i32) -> (i32, i32) {
    %c0_i32 = arith.constant 0 : i32
    %c0_i32_0 = arith.constant 0 : i32
    return %arg0, %c0_i32 : i32, i32
  }
  func.func @transform_3(%arg0: i32, %arg1: i32) -> (i32, i32) {
    %c0_i32 = arith.constant 0 : i32
    %c0_i32_0 = arith.constant 0 : i32
    return %arg0, %c0_i32 : i32, i32
  }
}

</mosaic_0001>

<bundles_post_ra>
// kernel: tpu_custom_call.1
= control target key start
LH: loop header
LB: loop body
LE: loop exit
PB: predicated region body
PF: predicated region fallthrough
CT: control target
= control target key end

     0   :  { %9 = vsyncpa [#allocation5], 0  ;;  %vm73_vm0 = vcmask 31744   ;;  %s300_s0 = inlined_call_operand.vmem [shape: f32[8,4], index: 0, kind: input, shape index: {}]   ;;  %s301_s1 = inlined_call_operand.vmem [shape: s32[8,1], index: 1, kind: input, shape index: {}]   ;;  %s302_s2 = inlined_call_operand.hbm [shape: f32[1,128], index: 2, kind: output, shape index: {0}]   ;;  %s303_s3 = inlined_call_operand.hbm [shape: f32[1,128], index: 3, kind: output, shape index: {1}]  }
   0x1   :  { %v78_v0 = vld [vmem:[%s301_s1] sm:$0xff] }
   0x2   :  { %10 = vsyncpa [#allocation7], 0  ;;  %v235_v1 = vmov 0   ;;  %v236_v2 = vmov 0.0   ;;  %vm75_vm1 = vcmask 7168   ;;  %vm99_vm2 = vcmp.ne.s32.totalorder %v78_v0, 4294967196 }
   0x3   :  { %186 = vset.pattern.permute.xlu0 %v235_v1  ;;  %74 = vst.msk [vmem:[#allocation2] sm:$0xff] %vm73_vm0, %v236_v2  ;;  %v177_v3 = vsel %vm99_vm2, 1.0, %v236_v2  ;;  %v87_v8 = vlaneseq  ;;  %v77_v10 = vld [vmem:[%s300_s0] sm:$0xff]  ;;  %s237_s0 = smov [#allocation4]   ;;  %s238_s16 = smov [#allocation6]  }
   0x4   :  { %90 = vperm.xlu0 %186, %v78_v0   ;;  %76 = vst.msk [vmem:[#allocation3] sm:$0xff] %vm75_vm1, %v236_v2  ;;  %s143_s15 = sshll.u32 %s237_s0, 4  ;;  %s153_s17 = sshll.u32 %s238_s16, 4  ;;  %s144_s15 = int_to_ptr.vmem [resolvable:$true] %s143_s15  ;;  %s268_s17 = int_to_ptr.vmem [resolvable:$true] %s153_s17 }
   0x5   :  { %v88_v9 = vand.u32 127, %v87_v8  ;;  %s187_s20 = scalar_lea.vmem %s144_s15, 16  ;;  %s191_s21 = scalar_lea.vmem %s144_s15, 32 }
   0x6   :  { %p188_p0 = scmp.ne.s32.totalorder %s144_s15, %s187_s20  ;;  %p192_p1 = scmp.lt.s32.totalorder %s144_s15, %s144_s15 }
   0x7   :  { %p193_p2 = scmp.lt.s32.totalorder %s191_s21, %s187_s20 }
   0x9   :  { %p194_p3 = por %p193_p2, %p192_p1 }
   0xa   :  { %v94_v12 = vld [vmem:[#allocation2] sm:$0xff] }
   0xb   :  { %v101_v4 = vld [vmem:[#allocation3] sm:$0xff]  ;;  %p195_p4 = pnand %p194_p3, %p188_p0 }
   0xc   :  { %v105_v5 = vadd.f32 %v177_v3, %v101_v4 }
   0xe   :  { %107 = vst.msk [vmem:[#allocation3] sm:$0xff] %vm75_vm1, %v105_v5 }
  0x15   :  { %v124_v6 = vld [vmem:[#allocation3] sm:$0xff] }
  0x16   :  { %v125_v7 = vsel %vm75_vm1, %v124_v6, 0.0 }
  0x17   :  { %126 = vadd.xlane.f32.xlu1 %v125_v7 }
  0x83   :  { %v91_v11 = vpop.permute.xlu0 %90 }
  0x84   :  { %vm92_vm3 = vcmp.eq.s32.totalorder %v88_v9, %v91_v11 }
  0x85   :  { %v93_v13 = vsel %vm92_vm3, %v77_v10, 0.0 }
  0x86   :  { %v96_v14 = vadd.f32 %v94_v12, %v93_v13 }
  0x88   :  { %98 = vst.msk [vmem:[#allocation2] sm:$0xff] %vm73_vm0, %v96_v14 }
  0x8f   :  { %v111_v15 = vld [vmem:[#allocation2] sm:$0xff] }
  0x90   :  { %v112_v16 = vsel %vm73_vm0, %v111_v15, 0.0 }
  0x91   :  { %113 = vadd.xlane.f32.xlu0 %v112_v16 }
  0xa4   :  { %v127_v17 = vpop.xlane.xlu1 %126 }
  0xa5   :  { %v128_v18 = vrot.slane %v127_v17, 4 }
  0xa7   :  { %v129_v19 = vadd.f32 %v128_v18, %v127_v17 }
  0xa9   :  { %v130_v20 = vrot.slane %v129_v19, 2 }
  0xab   :  { %v131_v24 = vadd.f32 %v130_v20, %v129_v19 }
  0xad   :  { %v132_v27 = vrot.slane %v131_v24, 1 }
  0xaf   :  { %v133_v30 = vadd.f32 %v132_v27, %v131_v24 }
 0x11e   :  { %v114_v21 = vpop.xlane.xlu0 %113 }
 0x11f   :  { %v115_v22 = vrot.slane %v114_v21, 4 }
 0x121   :  { %v116_v23 = vadd.f32 %v115_v22, %v114_v21 }
 0x123   :  { %v117_v25 = vrot.slane %v116_v23, 2 }
 0x125   :  { %v118_v26 = vadd.f32 %v117_v25, %v116_v23 }
 0x127   :  { %v119_v28 = vrot.slane %v118_v26, 1 }
 0x129   :  { %v120_v29 = vadd.f32 %v119_v28, %v118_v26 }
 0x12b   :  { %178 = vpush %v120_v29 }
 0x12c   :  { %180 = vpush %v133_v30 }
 0x15c   :  { %s179_s18 = spop %178 }
 0x15d   :  { %v122_v31 = vstv %s179_s18  ;;  %s181_s19 = spop %180 }
 0x15e   :  { %123 = vst [vmem:[#allocation4] sm:$0x1] %v122_v31  ;;  %v135_v32 = vstv %s181_s19 }
 0x15f   :  { %136 = vst [vmem:[#allocation6] sm:$0x1] %v135_v32 }
 0x160   :  { %198 = shalt.err (!%p195_p4)
}
 0x161   :  { %s199_s24 = scalar_lea.hbm %s302_s2, 16 }
 0x162   :  { %p200_p5 = scmp.ne.s32.totalorder %s302_s2, %s199_s24  ;;  %p203_p6 = scmp.lt.u32.totalorder %s199_s24, %s302_s2 }
 0x164   :  { %p205_p7 = pnand %p203_p6, %p200_p5 }
 0x166   :  { %208 = shalt.err (!%p205_p7)
}
 0x167   :  { %146 = dma.vmem_to_hbm [thread:$0]  %s144_s15, 16, %s302_s2, [#allocation5]  }
 0x168   :  { %s209_s4 = scalar_lea.vmem %s268_s17, 16  ;;  %s213_s5 = scalar_lea.vmem %s268_s17, 32 }
 0x169   :  { %p210_p8 = scmp.ne.s32.totalorder %s268_s17, %s209_s4  ;;  %p214_p9 = scmp.lt.s32.totalorder %s268_s17, %s268_s17 }
 0x16a   :  { %p215_p10 = scmp.lt.s32.totalorder %s213_s5, %s209_s4 }
 0x16c   :  { %p216_p11 = por %p215_p10, %p214_p9 }
 0x16e   :  { %p217_p12 = pnand %p216_p11, %p210_p8 }
 0x170   :  { %220 = shalt.err (!%p217_p12)
}
 0x171   :  { %s221_s8 = scalar_lea.hbm %s303_s3, 16 }
 0x172   :  { %p222_p13 = scmp.ne.s32.totalorder %s303_s3, %s221_s8  ;;  %p225_p0 = scmp.lt.u32.totalorder %s221_s8, %s303_s3 }
 0x174   :  { %p227_p1 = pnand %p225_p0, %p222_p13 }
 0x176   :  { %230 = shalt.err (!%p227_p1)
}
 0x177   :  { %156 = dma.vmem_to_hbm [thread:$0]  %s268_s17, 16, %s303_s3, [#allocation7]  }
 0x178   :  { %231 = dma.done.wait [#allocation5], 16  }
 0x179   :  { %232 = vsyncadd [#allocation5], 4294967280 }
 0x17a   :  { %233 = dma.done.wait [#allocation7], 16  }
 0x17b   :  { %234 = vsyncadd [#allocation7], 4294967280 }
 0x17c   :  { %163 = vsyncpa [#allocation5], 1 }
 0x17d   :  { %164 = vsyncpa [#allocation7], 1 }

</bundles_post_ra>
